<compile_context>
chip_gen: v7x
topology: tpu7x:2x2x1
jax: 0.10.0
libtpu: 0.0.40
codegen_flags: <defaults>
</compile_context>

<pallas_src>
import functools

import jax
import jax.numpy as jnp
from jax.experimental import pallas as pl
from jax.experimental.pallas import tpu as pltpu

EPS = 1e-5


# --------------------------------- kernel ---------------------------------
def _cnn_block_kernel(x_ref, kp_ref, kn_ref, w1_ref, b1_ref, w2_ref, b2_ref,
                      o_ref, *, identity_residual):
    # x_ref : [R, Cin]   compute dtype, R = TB*L_pad rows (TB whole samples)
    # kp/kn : [R, 1]     0/1 keep-masks for the prev/next conv taps
    # w1_ref: [3*Cin, Cout] stacked conv1 taps (BN1 folded); when the module
    #         has a downsample, Cout extra columns hold the BN-folded 1x1
    #         downsample weight on the center-tap rows (zeros elsewhere).
    # w2_ref: [3*Cout, Cout] stacked conv2 taps (BN2 folded)
    # b*_ref: [1, Cout] f32 (BN-folded; downsample bias already folded into b2)
    # o_ref : [R, Cout]
    R, cout = o_ref.shape
    x = x_ref[...]
    kp = kp_ref[...]
    kn = kn_ref[...]

    def tap_concat(v):
        # [v[r-1]*kp, v[r], v[r+1]*kn] along lanes -> one K=3*C matmul per conv.
        # pltpu.roll requires a non-negative shift; shift=R-1 is the circular
        # equivalent of -1 and the wrapped rows are zeroed by kp/kn.
        prev = pltpu.roll(v, shift=1, axis=0) * kp
        nxt = pltpu.roll(v, shift=R - 1, axis=0) * kn
        return jnp.concatenate([prev, v, nxt], axis=1)

    # conv1 (+ fused 1x1 downsample): one MXU matmul, f32 accumulation.
    y1 = jnp.dot(tap_concat(x), w1_ref[...], preferred_element_type=jnp.float32)
    if identity_residual:
        h_pre, res = y1, x.astype(jnp.float32)
    else:
        h_pre, res = y1[:, :cout], y1[:, cout:]
    h = jnp.maximum(h_pre + b1_ref[...], 0.0)

    # conv2: one MXU matmul; b2 already includes the downsample BN bias.
    y2 = jnp.dot(tap_concat(h.astype(x.dtype)), w2_ref[...],
                 preferred_element_type=jnp.float32)
    o_ref[...] = jnp.maximum(y2 + b2_ref[...] + res, 0.0).astype(o_ref.dtype)


# ------------------------------ wrapper utils ------------------------------
def _fold_bn(conv_b, gamma, beta, mean, var, eps=EPS):
    """BN(conv(x)+b) == conv_with_weight(w*s)(x) + (beta + (b - mean)*s)."""
    s = (gamma / jnp.sqrt(var + eps)).astype(jnp.float32)               # [Cout]
    b = (beta + (conv_b - mean) * s).reshape(1, -1).astype(jnp.float32)  # [1,Cout]
    return s, b


def _stack_taps(conv_w, scale):
    """torch Conv1d weight [Cout, Cin, 3] -> tap-stacked [3*Cin, Cout] (f32),
    BN scale folded into the output-channel axis.  Row blocks correspond to
    the taps applied to [x[t-1], x[t], x[t+1]], matching tap_concat()."""
    w = jnp.transpose(conv_w, (2, 1, 0)).astype(jnp.float32) * scale[None, None, :]
    return w.reshape(-1, w.shape[-1])


def _pick_tb(B, L_pad, Cin, Cout, n1, cd, od, vmem_budget=24 * 1024 * 1024):
    """Samples per grid step.  Rows per step are bounded by a per-row VMEM
    estimate counting double-buffered I/O blocks plus in-body temporaries
    (tap-concat inputs, rolled copies, f32 partials); the grid prefers >=4
    (even) steps so each v7x TensorCore pipelines >=2 blocks."""
    per_row = (
        2 * Cin * cd + 2 * Cout * od + 4 * cd                 # dbl-buffered x/out + masks
        + (3 * Cin + 3 * Cout + 2 * max(Cin, Cout)) * cd      # tap-concats + rolled temps
        + (n1 + 3 * Cout) * 4                                 # f32 partials: y1, h, res, y2
    )
    fixed = 2 * ((3 * Cin * n1 + 3 * Cout * Cout) * cd + 2 * Cout * 4)  # weights + biases
    max_rows = max((vmem_budget - fixed) // per_row, L_pad)
    max_tb = max(1, min(B, max_rows // L_pad))
    divisors = [d for d in range(1, B + 1) if B % d == 0 and d <= max_tb] or [1]
    for ok in (lambda s: s >= 4 and s % 2 == 0,   # >=2 blocks per v7x TensorCore
               lambda s: s >= 2,                  # keep the DMA pipeline busy
               lambda s: True):
        cands = [d for d in divisors if ok(B // d)]
        if cands:
            return max(cands)
    return 1


def _cnn_block_nlc(x_blc, p, compute_dtype, out_dtype):
    """Core, channels-last: x [B, L, Cin] -> [B, L, Cout]."""
    B, L, Cin = x_blc.shape
    Cout = p['conv1_w'].shape[0]
    has_ds = 'convd_w' in p            # module uses downsample iff Cin != Cout
    out_dtype = compute_dtype if out_dtype is None else out_dtype

    cd = jnp.dtype(compute_dtype).itemsize
    od = jnp.dtype(out_dtype).itemsize
    sub = 8 * (4 // cd)                # sublane granule: 8 rows (f32) / 16 (bf16)
    L_pad = ((L + sub - 1) // sub) * sub

    x_blc = x_blc.astype(compute_dtype)
    if L_pad != L:
        # Per-sample row padding keeps every block sublane-aligned (removes the
        # old full-array-block fallback); pad rows never feed real rows (masks)
        # and are sliced off below.
        x_blc = jnp.pad(x_blc, ((0, 0), (0, L_pad - L), (0, 0)))
    x2d = x_blc.reshape(B * L_pad, Cin)

    # Fold BN: scale into the conv weights, shift into the biases.
    s1, b1 = _fold_bn(p['conv1_b'], p['bn1_g'], p['bn1_b'], p['bn1_m'], p['bn1_v'])
    s2, b2 = _fold_bn(p['conv2_b'], p['bn2_g'], p['bn2_b'], p['bn2_m'], p['bn2_v'])
    w1s = _stack_taps(p['conv1_w'], s1)                          # [3*Cin, Cout]
    w2s = _stack_taps(p['conv2_w'], s2).astype(compute_dtype)    # [3*Cout, Cout]

    if has_ds:
        sd, bd = _fold_bn(p['convd_b'], p['bnd_g'], p['bnd_b'], p['bnd_m'], p['bnd_v'])
        wd = p['convd_w'][:, :, 0].T * sd[None, :]               # [Cin, Cout] f32
        zeros = jnp.zeros((Cin, Cout), jnp.float32)
        wd_taps = jnp.concatenate([zeros, wd, zeros], axis=0)    # center tap only
        w1s = jnp.concatenate([w1s, wd_taps], axis=1)            # [3*Cin, 2*Cout]
        b2 = b2 + bd                 # residual bias folded into the final bias
    w1s = w1s.astype(compute_dtype)
    n1 = w1s.shape[1]

    TB = _pick_tb(B, L_pad, Cin, Cout, n1, cd, od)
    R = TB * L_pad
    grid = (B // TB,)

    # Per-sample boundary keep-masks, (R, 1), 0/1 in the compute dtype: they
    # zero the conv taps that would read across sample boundaries (same effect
    # as the reference's padding=1) and keep pad rows out of real rows.
    rid = jnp.arange(R, dtype=jnp.int32) % L_pad
    keep_prev = (rid != 0).astype(compute_dtype).reshape(R, 1)
    keep_next = (rid != (L - 1)).astype(compute_dtype).reshape(R, 1)

    out2d = pl.pallas_call(
        functools.partial(_cnn_block_kernel, identity_residual=not has_ds),
        out_shape=jax.ShapeDtypeStruct((B * L_pad, Cout), out_dtype),
        grid_spec=pltpu.PrefetchScalarGridSpec(
            num_scalar_prefetch=0,
            grid=grid,
            in_specs=[
                pl.BlockSpec((R, Cin), lambda i: (i, 0)),         # activations
                pl.BlockSpec((R, 1), lambda i: (0, 0)),           # keep_prev mask
                pl.BlockSpec((R, 1), lambda i: (0, 0)),           # keep_next mask
                pl.BlockSpec((3 * Cin, n1), lambda i: (0, 0)),    # conv1 (+ds) weight
                pl.BlockSpec((1, Cout), lambda i: (0, 0)),        # bias1
                pl.BlockSpec((3 * Cout, Cout), lambda i: (0, 0)), # conv2 weight
                pl.BlockSpec((1, Cout), lambda i: (0, 0)),        # bias2 (+ds bias)
            ],
            out_specs=pl.BlockSpec((R, Cout), lambda i: (i, 0)),
        ),
        compiler_params=pltpu.CompilerParams(
            dimension_semantics=("parallel",),
            vmem_limit_bytes=48 * 1024 * 1024,
        ),
    )(x2d, keep_prev, keep_next, w1s, b1, w2s, b2)

    out = out2d.reshape(B, L_pad, Cout)
    if L_pad != L:
        out = out[:, :L, :]
    return out


def cnn_block_forward(x, p, *, compute_dtype=jnp.bfloat16, out_dtype=None,
                      channels_last=False):
    """CNNBlock forward.  Default x: [B, C_in, L] (PyTorch NCL, module parity;
    costs two wrapper transposes).  With channels_last=True, x: [B, L, C_in]
    and the kernel runs with zero wrapper transposes (preferred layout)."""
    if channels_last:
        return _cnn_block_nlc(x, p, compute_dtype, out_dtype)
    y = _cnn_block_nlc(jnp.transpose(x, (0, 2, 1)), p, compute_dtype, out_dtype)
    return jnp.transpose(y, (0, 2, 1))


# ---------------- pure-JAX reference (eval-mode BatchNorm) ----------------
def reference_forward(x, p, eps=EPS):
    def conv1d(x, w, b, pad):
        y = jax.lax.conv_general_dilated(
            x, w, window_strides=(1,), padding=[(pad, pad)],
            dimension_numbers=('NCH', 'OIH', 'NCH'))
        return y + b[None, :, None]

    def bn(x, g, be, m, v):
        return (x - m[None, :, None]) / jnp.sqrt(v[None, :, None] + eps) \
            * g[None, :, None] + be[None, :, None]

    out = jax.nn.relu(bn(conv1d(x, p['conv1_w'], p['conv1_b'], 1),
                         p['bn1_g'], p['bn1_b'], p['bn1_m'], p['bn1_v']))
    out = bn(conv1d(out, p['conv2_w'], p['conv2_b'], 1),
             p['bn2_g'], p['bn2_b'], p['bn2_m'], p['bn2_v'])
    if 'convd_w' in p:
        res = bn(conv1d(x, p['convd_w'], p['convd_b'], 0),
                 p['bnd_g'], p['bnd_b'], p['bnd_m'], p['bnd_v'])
    else:
        res = x
    return jax.nn.relu(out + res)


def make_params(key, cin, cout):
    keys = jax.random.split(key, 12)
    p = {
        'conv1_w': 0.3 * jax.random.normal(keys[0], (cout, cin, 3), jnp.float32),
        'conv1_b': 0.1 * jax.random.normal(keys[1], (cout,), jnp.float32),
        'bn1_g': jax.random.uniform(keys[2], (cout,), jnp.float32, 0.5, 1.5),
        'bn1_b': 0.1 * jax.random.normal(keys[3], (cout,), jnp.float32),
        'bn1_m': 0.1 * jax.random.normal(keys[4], (cout,), jnp.float32),
        'bn1_v': jax.random.uniform(keys[5], (cout,), jnp.float32, 0.5, 1.5),
        'conv2_w': 0.3 * jax.random.normal(keys[6], (cout, cout, 3), jnp.float32),
        'conv2_b': 0.1 * jax.random.normal(keys[7], (cout,), jnp.float32),
        'bn2_g': jax.random.uniform(keys[8], (cout,), jnp.float32, 0.5, 1.5),
        'bn2_b': 0.1 * jax.random.normal(keys[9], (cout,), jnp.float32),
        'bn2_m': 0.1 * jax.random.normal(keys[10], (cout,), jnp.float32),
        'bn2_v': jax.random.uniform(keys[11], (cout,), jnp.float32, 0.5, 1.5),
    }
    if cin != cout:
        dkeys = jax.random.split(jax.random.fold_in(key, 7), 6)
        p.update({
            'convd_w': 0.3 * jax.random.normal(dkeys[0], (cout, cin, 1), jnp.float32),
            'convd_b': 0.1 * jax.random.normal(dkeys[1], (cout,), jnp.float32),
            'bnd_g': jax.random.uniform(dkeys[2], (cout,), jnp.float32, 0.5, 1.5),
            'bnd_b': 0.1 * jax.random.normal(dkeys[3], (cout,), jnp.float32),
            'bnd_m': 0.1 * jax.random.normal(dkeys[4], (cout,), jnp.float32),
            'bnd_v': jax.random.uniform(dkeys[5], (cout,), jnp.float32, 0.5, 1.5),
        })
    return p


if __name__ == "__main__":
    key = jax.random.PRNGKey(0)

    # ---- Case 1: in_channels != out_channels (fused downsample path) ----
    B, C_IN, C_OUT, L = 2, 4, 8, 16
    kx, kparam = jax.random.split(key)
    x = jax.random.normal(kx, (B, C_IN, L), jnp.float32)
    params = make_params(kparam, C_IN, C_OUT)
    ref = jax.block_until_ready(reference_forward(x, params))

    out_f32 = jax.block_until_ready(
        cnn_block_forward(x, params, compute_dtype=jnp.float32))
    assert out_f32.shape == (B, C_OUT, L)
    err = jnp.max(jnp.abs(out_f32 - ref))
    assert jnp.allclose(out_f32, ref, rtol=1e-4, atol=1e-4), f"f32 max abs err {err}"

    # default path: bf16 compute, bf16 output (loose tolerance)
    out_bf16 = jax.block_until_ready(cnn_block_forward(x, params))
    err = jnp.max(jnp.abs(out_bf16.astype(jnp.float32) - ref))
    assert jnp.allclose(out_bf16.astype(jnp.float32), ref, rtol=1e-1, atol=1e-1), \
        f"bf16 max abs err {err}"

    # channels-last entry point (preferred layout: no wrapper transposes)
    out_nlc = jax.block_until_ready(
        cnn_block_forward(jnp.transpose(x, (0, 2, 1)), params,
                          compute_dtype=jnp.float32, channels_last=True))
    assert jnp.allclose(jnp.transpose(out_nlc, (0, 2, 1)), ref,
                        rtol=1e-4, atol=1e-4), "channels_last path mismatch"

    # ---- Case 2: in_channels == out_channels (identity residual) ----
    kx2, kparam2 = jax.random.split(jax.random.fold_in(key, 1))
    x2 = jax.random.normal(kx2, (B, C_OUT, L), jnp.float32)
    params2 = make_params(kparam2, C_OUT, C_OUT)
    ref2 = jax.block_until_ready(reference_forward(x2, params2))
    out2 = jax.block_until_ready(
        cnn_block_forward(x2, params2, compute_dtype=jnp.float32))
    assert out2.shape == (B, C_OUT, L)
    err = jnp.max(jnp.abs(out2 - ref2))
    assert jnp.allclose(out2, ref2, rtol=1e-4, atol=1e-4), \
        f"identity-case max abs err {err}"

    # ---- Case 3: odd length (exercises per-sample row padding + masks) ----
    kx3, kparam3 = jax.random.split(jax.random.fold_in(key, 2))
    B3, L3 = 4, 13
    x3 = jax.random.normal(kx3, (B3, C_IN, L3), jnp.float32)
    params3 = make_params(kparam3, C_IN, C_OUT)
    ref3 = jax.block_until_ready(reference_forward(x3, params3))
    out3 = jax.block_until_ready(
        cnn_block_forward(x3, params3, compute_dtype=jnp.float32))
    assert out3.shape == (B3, C_OUT, L3)
    err = jnp.max(jnp.abs(out3 - ref3))
    assert jnp.allclose(out3, ref3, rtol=1e-4, atol=1e-4), \
        f"odd-length max abs err {err}"

    print("KERNEL_OK")
</pallas_src>

<mosaic_0001>
module attributes {stable_mosaic.version = 11 : i64} {
  func.func @_cnn_block_kernel(%arg0: i32, %arg1: memref<16x4xf32, #tpu.memory_space<vmem>>, %arg2: memref<16x1xf32, #tpu.memory_space<vmem>>, %arg3: memref<16x1xf32, #tpu.memory_space<vmem>>, %arg4: memref<12x16xf32, #tpu.memory_space<vmem>>, %arg5: memref<1x8xf32, #tpu.memory_space<vmem>>, %arg6: memref<24x8xf32, #tpu.memory_space<vmem>>, %arg7: memref<1x8xf32, #tpu.memory_space<vmem>>, %arg8: memref<16x8xf32, #tpu.memory_space<vmem>>) attributes {dimension_semantics = [#tpu.dimension_semantics<parallel>], iteration_bounds = array<i64: 2>, scalar_prefetch = 0 : i64, scratch_operands = 0 : i64, tpu.core_type = #tpu.core_type<tc>, window_params = [{transform_indices = @transform_0, window_bounds = array<i64: 16, 4>}, {pipeline_mode = #tpu.pipeline_mode<synchronous>, transform_indices = @transform_1, window_bounds = array<i64: 16, 1>}, {pipeline_mode = #tpu.pipeline_mode<synchronous>, transform_indices = @transform_2, window_bounds = array<i64: 16, 1>}, {pipeline_mode = #tpu.pipeline_mode<synchronous>, transform_indices = @transform_3, window_bounds = array<i64: 12, 16>}, {pipeline_mode = #tpu.pipeline_mode<synchronous>, transform_indices = @transform_4, window_bounds = array<i64: 1, 8>}, {pipeline_mode = #tpu.pipeline_mode<synchronous>, transform_indices = @transform_5, window_bounds = array<i64: 24, 8>}, {pipeline_mode = #tpu.pipeline_mode<synchronous>, transform_indices = @transform_6, window_bounds = array<i64: 1, 8>}, {transform_indices = @transform_7, window_bounds = array<i64: 16, 8>}]} {
    %c0 = arith.constant 0 : index
    %c0_0 = arith.constant 0 : index
    %0 = vector.load %arg1[%c0, %c0_0] : memref<16x4xf32, #tpu.memory_space<vmem>>, vector<16x4xf32>
    %c0_1 = arith.constant 0 : index
    %c0_2 = arith.constant 0 : index
    %1 = vector.load %arg2[%c0_1, %c0_2] : memref<16x1xf32, #tpu.memory_space<vmem>>, vector<16x1xf32>
    %c0_3 = arith.constant 0 : index
    %c0_4 = arith.constant 0 : index
    %2 = vector.load %arg3[%c0_3, %c0_4] : memref<16x1xf32, #tpu.memory_space<vmem>>, vector<16x1xf32>
    %c1_i32 = arith.constant 1 : i32
    %3 = tpu.dynamic_rotate %0 by %c1_i32 dim 0 : vector<16x4xf32>, i32 -> vector<16x4xf32>
    %4 = vector.broadcast %1 : vector<16x1xf32> to vector<16x4xf32>
    %5 = arith.mulf %3, %4 : vector<16x4xf32>
    %c15_i32 = arith.constant 15 : i32
    %6 = tpu.dynamic_rotate %0 by %c15_i32 dim 0 : vector<16x4xf32>, i32 -> vector<16x4xf32>
    %7 = vector.broadcast %2 : vector<16x1xf32> to vector<16x4xf32>
    %8 = arith.mulf %6, %7 : vector<16x4xf32>
    %9 = tpu.concatenate %5, %0, %8 in 1 : vector<16x4xf32>, vector<16x4xf32>, vector<16x4xf32> -> vector<16x12xf32>
    %c0_5 = arith.constant 0 : index
    %c0_6 = arith.constant 0 : index
    %10 = vector.load %arg4[%c0_5, %c0_6] : memref<12x16xf32, #tpu.memory_space<vmem>>, vector<12x16xf32>
    %cst = arith.constant dense<0.000000e+00> : vector<16x16xf32>
    %11 = tpu.matmul %9, %10, %cst {dimension_numbers = #tpu.dot_dimension_numbers<[1], [0], [0], [1], [0, 0, 1, 1], [], []>} : vector<16x12xf32>, vector<12x16xf32>, vector<16x16xf32> -> vector<16x16xf32>
    %12 = vector.extract_strided_slice %11 {offsets = [0, 0], sizes = [16, 8], strides = [1, 1]} : vector<16x16xf32> to vector<16x8xf32>
    %13 = vector.extract_strided_slice %11 {offsets = [0, 8], sizes = [16, 8], strides = [1, 1]} : vector<16x16xf32> to vector<16x8xf32>
    %c0_7 = arith.constant 0 : index
    %c0_8 = arith.constant 0 : index
    %14 = vector.load %arg5[%c0_7, %c0_8] : memref<1x8xf32, #tpu.memory_space<vmem>>, vector<1x8xf32>
    %15 = vector.broadcast %14 : vector<1x8xf32> to vector<16x8xf32>
    %16 = arith.addf %12, %15 : vector<16x8xf32>
    %cst_9 = arith.constant 0.000000e+00 : f32
    %17 = vector.broadcast %cst_9 : f32 to vector<16x8xf32>
    %18 = arith.maximumf %16, %17 : vector<16x8xf32>
    %c1_i32_10 = arith.constant 1 : i32
    %19 = tpu.dynamic_rotate %18 by %c1_i32_10 dim 0 : vector<16x8xf32>, i32 -> vector<16x8xf32>
    %20 = vector.broadcast %1 : vector<16x1xf32> to vector<16x8xf32>
    %21 = arith.mulf %19, %20 : vector<16x8xf32>
    %c15_i32_11 = arith.constant 15 : i32
    %22 = tpu.dynamic_rotate %18 by %c15_i32_11 dim 0 : vector<16x8xf32>, i32 -> vector<16x8xf32>
    %23 = vector.broadcast %2 : vector<16x1xf32> to vector<16x8xf32>
    %24 = arith.mulf %22, %23 : vector<16x8xf32>
    %25 = tpu.concatenate %21, %18, %24 in 1 : vector<16x8xf32>, vector<16x8xf32>, vector<16x8xf32> -> vector<16x24xf32>
    %c0_12 = arith.constant 0 : index
    %c0_13 = arith.constant 0 : index
    %26 = vector.load %arg6[%c0_12, %c0_13] : memref<24x8xf32, #tpu.memory_space<vmem>>, vector<24x8xf32>
    %cst_14 = arith.constant dense<0.000000e+00> : vector<16x8xf32>
    %27 = tpu.matmul %25, %26, %cst_14 {dimension_numbers = #tpu.dot_dimension_numbers<[1], [0], [0], [1], [0, 0, 1, 1], [], []>} : vector<16x24xf32>, vector<24x8xf32>, vector<16x8xf32> -> vector<16x8xf32>
    %c0_15 = arith.constant 0 : index
    %c0_16 = arith.constant 0 : index
    %28 = vector.load %arg7[%c0_15, %c0_16] : memref<1x8xf32, #tpu.memory_space<vmem>>, vector<1x8xf32>
    %29 = vector.broadcast %28 : vector<1x8xf32> to vector<16x8xf32>
    %30 = arith.addf %27, %29 : vector<16x8xf32>
    %31 = arith.addf %30, %13 : vector<16x8xf32>
    %cst_17 = arith.constant 0.000000e+00 : f32
    %32 = vector.broadcast %cst_17 : f32 to vector<16x8xf32>
    %33 = arith.maximumf %31, %32 : vector<16x8xf32>
    %c0_18 = arith.constant 0 : index
    %c0_19 = arith.constant 0 : index
    %34 = vector.load %arg8[%c0_18, %c0_19] : memref<16x8xf32, #tpu.memory_space<vmem>>, vector<16x8xf32>
    tpu.vector_store %arg8[%c0_18, %c0_19], %33 {strides = array<i32>} : memref<16x8xf32, #tpu.memory_space<vmem>>, vector<16x8xf32>,
    return
  }
  func.func @transform_0(%arg0: i32) -> (i32, i32) {
    %c0_i32 = arith.constant 0 : i32
    %c0_i32_0 = arith.constant 0 : i32
    return %arg0, %c0_i32 : i32, i32
  }
  func.func @transform_1(%arg0: i32) -> (i32, i32) {
    %c0_i32 = arith.constant 0 : i32
    %c0_i32_0 = arith.constant 0 : i32
    %c0_i32_1 = arith.constant 0 : i32
    return %c0_i32, %c0_i32_0 : i32, i32
  }
  func.func @transform_2(%arg0: i32) -> (i32, i32) {
    %c0_i32 = arith.constant 0 : i32
    %c0_i32_0 = arith.constant 0 : i32
    %c0_i32_1 = arith.constant 0 : i32
    return %c0_i32, %c0_i32_0 : i32, i32
  }
  func.func @transform_3(%arg0: i32) -> (i32, i32) {
    %c0_i32 = arith.constant 0 : i32
    %c0_i32_0 = arith.constant 0 : i32
    %c0_i32_1 = arith.constant 0 : i32
    return %c0_i32, %c0_i32_0 : i32, i32
  }
  func.func @transform_4(%arg0: i32) -> (i32, i32) {
    %c0_i32 = arith.constant 0 : i32
    %c0_i32_0 = arith.constant 0 : i32
    %c0_i32_1 = arith.constant 0 : i32
    return %c0_i32, %c0_i32_0 : i32, i32
  }
  func.func @transform_5(%arg0: i32) -> (i32, i32) {
    %c0_i32 = arith.constant 0 : i32
    %c0_i32_0 = arith.constant 0 : i32
    %c0_i32_1 = arith.constant 0 : i32
    return %c0_i32, %c0_i32_0 : i32, i32
  }
  func.func @transform_6(%arg0: i32) -> (i32, i32) {
    %c0_i32 = arith.constant 0 : i32
    %c0_i32_0 = arith.constant 0 : i32
    %c0_i32_1 = arith.constant 0 : i32
    return %c0_i32, %c0_i32_0 : i32, i32
  }
  func.func @transform_7(%arg0: i32) -> (i32, i32) {
    %c0_i32 = arith.constant 0 : i32
    %c0_i32_0 = arith.constant 0 : i32
    return %arg0, %c0_i32 : i32, i32
  }
}

</mosaic_0001>

<bundles_post_ra>
// kernel: tpu_custom_call.1
= control target key start
LH: loop header
LB: loop body
LE: loop exit
PB: predicated region body
PF: predicated region fallthrough
CT: control target
= control target key end

     0   :  { %s763_s24 = smov 0   ;;  %s850_s0 = inlined_call_operand.vmem [shape: f32[32,4], index: 0, kind: input, shape index: {}]   ;;  %s851_s1 = inlined_call_operand.vmem [shape: f32[16,1], index: 1, kind: input, shape index: {}]   ;;  %s852_s2 = inlined_call_operand.vmem [shape: f32[16,1], index: 2, kind: input, shape index: {}]   ;;  %s853_s3 = inlined_call_operand.vmem [shape: f32[12,16], index: 3, kind: input, shape index: {}]   ;;  %s854_s4 = inlined_call_operand.vmem [shape: f32[1,8], index: 4, kind: input, shape index: {}]   ;;  %s855_s5 = inlined_call_operand.vmem [shape: f32[24,8], index: 5, kind: input, shape index: {}]   ;;  %s856_s6 = inlined_call_operand.vmem [shape: f32[1,8], index: 6, kind: input, shape index: {}]   ;;  %s857_s7 = inlined_call_operand.vmem [shape: f32[32,8], index: 7, kind: output, shape index: {}]  }
   0x1 LB: > { %s640_s25 = sadd.s32 4294967295, %s715_s24   ;;  %p644_p0 = scmp.ge.s32.totalorder %s715_s24, 1  ;;  %s715_s24 = sphi %s763_s24, %s17_s24  }
   0x2   : > { %p238_p1 = scmp.lt.s32.totalorder %s715_s24, 3 }
   0x4   : > { %p239_p2 = pnand %p644_p0, %p238_p1 }
   0x5   : > { %v286_v0 = vld [vmem:[%s852_s2] sm:$0xff] (!%p239_p2)  ;;  %s645_s30 = sshll.u32 (!%p239_p2), %s640_s25, 1  ;;  %v290_v2 = vlaneseq (!%p239_p2)  ;;  %v717_v3 = vmov (!%p239_p2), 0   ;;  %v287_v4 = vld [vmem:[%s852_s2 + $0x8] sm:$0xff] (!%p239_p2)  ;;  %s718_s16 = smov (!%p239_p2), 4   ;;  %vm355_vm2 = vcmask (!%p239_p2), 1043456  }
   0x6   : > { %242 = sbr.rel (%p239_p2) target bundleno = 816 (0x330), region = 48  ;;  %v284_v1 = vld [vmem:[%s851_s1] sm:$0xff] (!%p239_p2)  ;;  %707 = vset.pattern.permute.xlu0 (!%p239_p2), %v717_v3  ;;  %708 = vset.pattern.permute.xlu1 (!%p239_p2), %v717_v3  ;;  %p271_p3 = scmp.lt.s32.totalorder (!%p239_p2), %s645_s30, 3  ;;  %v285_v5 = vld [vmem:[%s851_s1 + $0x8] sm:$0xff] (!%p239_p2)  ;;  %vm719_vm3 = vmmov (!%p239_p2), 1   ;;  %vm340_vm5 = vcmask (!%p239_p2), 31744  }
   0x7   : > { %314 = vperm.xlu0 (!%p239_p2), %707, %v286_v0   ;;  %297 = vperm.xlu1 (!%p239_p2), %708, %v284_v1   ;;  %v785_v6 = vshrl.u32 (!%p239_p2), %v290_v2, 7  ;;  %v346_v17 = vld [vmem:[%s853_s3] sm:$0xff] (!%p239_p2)  ;;  %v347_v18 = vld [vmem:[%s853_s3 + $0x8] sm:$0xf] (!%p239_p2)  ;;  %vm684_vm4 = vmpackc.low (!%p239_p2), %vm355_vm2, %vm719_vm3  ;;  %s720_s21 = smov (!%p239_p2), 8   ;;  %vm343_vm6 = vcmask (!%p239_p2), 64512  }
   0x8   : > { %v683_v19 = vpack.c.bf16 (!%p239_p2), %v347_v18, %v346_v17  ;;  %vm348_vm7 = vcmask (!%p239_p2), 97280   ;;  %v478_v36 = vld [vmem:[%s855_s5] sm:$0xff] (!%p239_p2)  ;;  %v479_v37 = vld [vmem:[%s855_s5 + $0x8] sm:$0xff] (!%p239_p2)  ;;  %v480_v39 = vld [vmem:[%s855_s5 + $0x10] sm:$0xff] (!%p239_p2)  ;;  %s721_s9 = smov (!%p239_p2), 16   ;;  %s722_s10 = smov (!%p239_p2), 120  }
   0x9   : > { %vm309_vm0 = vcmp.lt.s32.totalorder (!%p239_p2), %v785_v6, 7  ;;  %vm292_vm1 = vcmp.lt.s32.totalorder (!%p239_p2), %v785_v6, 1  ;;  %v689_v38 = vpack.c.bf16 (!%p239_p2), %v479_v37, %v478_v36  ;;  %v652_v40 = vld [vmem:[%s854_s4] ss:$0 sm:$0xff] (!%p239_p2)  ;;  %vm475_vm8 = vcmask (!%p239_p2), 130048  }
   0xa   : > { %685 = vmatprep.subr.msk.bf16.mxu0 (!%p239_p2), %vm684_vm4, %v683_v19  ;;  %vm488_vm9 = vcmask (!%p239_p2), 195584   ;;  %v653_v3 = vld [vmem:[%s856_s6] ss:$0 sm:$0xff] (!%p239_p2) }
   0xb   : > { %319 = vperm.xlu0 (!%p239_p2), %707, %v287_v4   ;;  %302 = vperm.xlu1 (!%p239_p2), %708, %v285_v5  }
   0xc   : > { %688 = vmatpush3.bf16.msk.msra.mxu0 (!%p239_p2), %vm684_vm4, %v683_v19  ;;  %690 = vmatprep.subr.bf16.mxu1 (!%p239_p2), %v689_v38 }
   0xd   : > { %s859_s30 = smov (!%p271_p3, %s645_s30), 3  ;;  %692 = vmatpush3.bf16.msra.mxu1 %v689_v38 }
   0xe   : > { %s646_s12 = sshll.u32 %s859_s30, 3  ;;  %678 = vmatprep.subr.mxu1 %v480_v39 }
   0xf   : > { %s274_s15 = scalar_lea.vmem %s850_s0, %s646_s12 }
  0x10   : > { %v283_v7 = vld [vmem:[%s274_s15 + $0x8] sm:$0xff]  ;;  %v282_v8 = vld [vmem:[%s274_s15] sm:$0xff] }
  0x11   : > { %v289_v9 = vrot.slane %v283_v7, 7  ;;  %v308_v10 = vrot.slane %v283_v7, 1  ;;  %v288_v11 = vrot.slane %v282_v8, 7  ;;  %v307_v12 = vrot.slane %v282_v8, 1  ;;  %328 = vrot.lane.b32.xlu1 %v283_v7, %s718_s16  ;;  %326 = vrot.lane.b32.xlu0 %v282_v8, %s718_s16  ;;  %s280_s16 = scalar_lea.vmem %s857_s7, %s646_s12 }
  0x12   : > { %679 = vmatpush3.msra.mxu1 %v480_v39 }
  0x13   : > { %v310_v13 = vsel %vm309_vm0, %v307_v12, %v308_v10  ;;  %v311_v14 = vsel %vm309_vm0, %v308_v10, %v307_v12  ;;  %v294_v15 = vsel %vm292_vm1, %v289_v9, %v288_v11  ;;  %v293_v16 = vsel %vm292_vm1, %v288_v11, %v289_v9 }
  0x86   : > { %v315_v20 = vpop.permute.xlu0 %314  ;;  %v298_v24 = vpop.permute.xlu1 %297 }
  0x87   : > { %v322_v21 = vmul.f32 %v315_v20, %v310_v13  ;;  %v305_v26 = vmul.f32 %v298_v24, %v294_v15 }
  0x89   : > { %334 = vrot.lane.b32.xlu0 %v322_v21, %s720_s21 }
  0x8a   : > { %v320_v22 = vpop.permute.xlu0 %319  ;;  %v303_v25 = vpop.permute.xlu1 %302 }
  0x8b   : > { %v323_v23 = vmul.f32 %v320_v22, %v311_v14  ;;  %v306_v28 = vmul.f32 %v303_v25, %v293_v16 }
  0x8d   : > { %336 = vrot.lane.b32.xlu1 %v323_v23, %s720_s21 }
  0x8e   : > { %v327_v27 = vpop.permute.xlu0 %326  ;;  %v329_v29 = vpop.permute.xlu1 %328 }
  0x8f   : > { %v341_v30 = vsel %vm340_vm5, %v305_v26, %v327_v27  ;;  %v342_v33 = vsel %vm340_vm5, %v306_v28, %v329_v29 }
  0xfb   : > { %v335_v31 = vpop.permute.xlu0 %334 }
  0xfc   : > { %v344_v32 = vsel %vm343_vm6, %v341_v30, %v335_v31 }
  0xfd   : > { %671 = vmatprep.mubr.msk.f32.mxu0 %vm348_vm7, %v344_v32 }
  0xff   : > { %v337_v34 = vpop.permute.xlu1 %336 }
 0x100   : > { %v345_v35 = vsel %vm343_vm6, %v342_v33, %v337_v34 }
 0x101   : > { %672 = vmatmul.mubr.msk.f32.vlgmr.msra.gmra.mrb[0].mxu0 %vm348_vm7, %v345_v35 }
 0x1d4   : > { %v673_v41 = vpop.f32.mrb[0].mxu0 }
 0x1d5   : > { %v425_v42 = vpop.f32.mrb[1].mxu0  ;;  %v442_v43 = vadd.f32 %v673_v41, %v652_v40 }
 0x1d6   : > { %v441_v44 = vadd.f32 %v652_v40, %v425_v42 }
 0x1d7   : > { %v444_v45 = vmax.f32 %v442_v43, 0.0 }
 0x1d8   : > { %v443_v46 = vmax.f32 %v441_v44, 0.0 }
 0x1d9   : > { %v446_v47 = vrot.slane %v444_v45, 7  ;;  %v452_v48 = vrot.slane %v444_v45, 1  ;;  %461 = vrot.lane.b32.xlu1 %v444_v45, %s720_s21 }
 0x1da   : > { %v445_v49 = vrot.slane %v443_v46, 7  ;;  %v451_v50 = vrot.slane %v443_v46, 1  ;;  %459 = vrot.lane.b32.xlu0 %v443_v46, %s720_s21 }
 0x1dc   : > { %v454_v51 = vsel %vm309_vm0, %v452_v48, %v451_v50  ;;  %v453_v52 = vsel %vm309_vm0, %v451_v50, %v452_v48  ;;  %v447_v53 = vsel %vm292_vm1, %v445_v49, %v446_v47  ;;  %v448_v54 = vsel %vm292_vm1, %v446_v47, %v445_v49 }
 0x1dd   : > { %v456_v55 = vmul.f32 %v454_v51, %v320_v22  ;;  %v455_v56 = vmul.f32 %v453_v52, %v315_v20  ;;  %v450_v59 = vmul.f32 %v447_v53, %v303_v25  ;;  %v449_v60 = vmul.f32 %v448_v54, %v298_v24 }
 0x1df   : > { %469 = vrot.lane.b32.xlu1 %v456_v55, %s721_s9  ;;  %467 = vrot.lane.b32.xlu0 %v455_v56, %s721_s9 }
 0x1e3   : > { %574 = vrot.lane.b32.xlu1 %v673_v41, %s722_s10  ;;  %572 = vrot.lane.b32.xlu0 %v425_v42, %s722_s10 }
 0x24b   : > { %v462_v58 = vpop.permute.xlu1 %461 }
 0x24c   : > { %v460_v57 = vpop.permute.xlu0 %459  ;;  %v474_v61 = vsel %vm343_vm6, %v450_v59, %v462_v58 }
 0x24d   : > { %v473_v62 = vsel %vm343_vm6, %v449_v60, %v460_v57 }
 0x251   : > { %v470_v63 = vpop.permute.xlu1 %469  ;;  %v468_v0 = vpop.permute.xlu0 %467 }
 0x252   : > { %v477_v1 = vsel %vm475_vm8, %v474_v61, %v470_v63  ;;  %v476_v2 = vsel %vm475_vm8, %v473_v62, %v468_v0 }
 0x253   : > { %680 = vmatprep.mubr.msk.f32.mxu1 %vm488_vm9, %v476_v2 }
 0x254   : > { %681 = vmatmul.mubr.msk.f32.vlgmr.msra.gmra.mrb[0].mxu1 %vm488_vm9, %v477_v1 }
 0x255   : > { %v575_v7 = vpop.permute.xlu1 %574  ;;  %v573_v9 = vpop.permute.xlu0 %572 }
 0x327   : > { %v682_v4 = vpop.f32.mrb[0].mxu1 }
 0x328   : > { %v567_v5 = vadd.f32 %v682_v4, %v653_v3  ;;  %v561_v6 = vpop.f32.mrb[1].mxu1 }
 0x329   : > { %v562_v8 = vadd.f32 %v653_v3, %v561_v6 }
 0x32a   : > { %v579_v10 = vadd.f32 %v575_v7, %v567_v5 }
 0x32b   : > { %v578_v11 = vadd.f32 %v573_v9, %v562_v8 }
 0x32c   : > { %v581_v13 = vmax.f32 %v579_v10, 0.0 }
 0x32d   : > { %v580_v12 = vmax.f32 %v578_v11, 0.0 }
 0x32e   : > { %583 = vst.msk [vmem:[%s280_s16 + $0x8] sm:$0xff] %vm343_vm6, %v581_v13 }
 0x32f   : > { %582 = vst.msk [vmem:[%s280_s16] sm:$0xff] %vm343_vm6, %v580_v12 }
 0x330 PF: > { %s17_s24 = sadd.s32 1, %s715_s24  }
 0x331   : > { %p14_p4 = scmp.ge.s32.totalorder %s17_s24, 4  }
 0x333   :  { %16 = sbr.rel (!%p14_p4) target bundleno = 1 (0x1), region = 78 }

</bundles_post_ra>
